<compile_context>
chip_gen: v7x
topology: tpu7x:2x2x1
jax: 0.10.0
libtpu: 0.0.40
codegen_flags: <defaults>
</compile_context>

<pallas_src>
import functools

import jax
import jax.numpy as jnp
from jax.experimental import pallas as pl
from jax.experimental.pallas import tpu as pltpu


def _round_up(x, m):
    return ((x + m - 1) // m) * m


def _rec_head_kernel(x_ref, w_ref, b_ref, o_ref):
    # x_ref: (tm, K)  w_ref: (K, E_pad)  b_ref: (1, E_pad) f32  o_ref: (tm, E_pad)
    acc = jnp.dot(x_ref[...], w_ref[...], preferred_element_type=jnp.float32)  # MXU
    acc = acc + b_ref[...]                                                     # f32 epilogue
    o_ref[...] = acc.astype(o_ref.dtype)                                       # lane-dense store


@functools.partial(jax.jit, static_argnames=("row_tile",))
def rec_head_forward(x, weight, bias, *, row_tile=512):
    """RECHead.fc_decoder: y = x @ weight.T + bias, applied per token.

    x:      (B, N, in_dim)
    weight: (in_chans, in_dim)   -- PyTorch nn.Linear layout
    bias:   (in_chans,)
    returns (B, N, in_chans)
    """
    B, N, K = x.shape
    E, Kw = weight.shape
    assert Kw == K, f"in_dim mismatch: {Kw} vs {K}"

    rows = B * N
    # Row tiling: sublane axis must be a multiple of 8; cap the tile at row_tile rows.
    tm = min(row_tile, _round_up(rows, 8))
    rows_pad = _round_up(rows, tm)
    # Lane-dense output: pad output features up to a multiple of 128.
    E_pad = _round_up(E, 128)

    # Free reshape (contiguous); no activation transpose pass.
    x2 = x.reshape(rows, K)
    if rows_pad != rows:
        x2 = jnp.pad(x2, ((0, rows_pad - rows), (0, 0)))

    w2 = jnp.transpose(weight).astype(x.dtype)           # (K, E)
    if E_pad != E:
        w2 = jnp.pad(w2, ((0, 0), (0, E_pad - E)))
        b2 = jnp.pad(bias, (0, E_pad - E))
    else:
        b2 = bias
    b2 = b2.reshape(1, E_pad).astype(jnp.float32)

    n_row_tiles = rows_pad // tm
    itemsize = jnp.dtype(x.dtype).itemsize

    cost = pl.CostEstimate(
        flops=2 * rows_pad * K * E_pad,
        transcendentals=0,
        bytes_accessed=(rows_pad * K + K * E_pad + rows_pad * E_pad) * itemsize
        + E_pad * 4,
    )

    # VMEM budget: double-buffered x/out tiles + resident weight/bias (+1 MiB headroom),
    # clamped to a limit that is safe on v5e/v6e (128 MiB) and v7x (64 MiB physical).
    vmem_bytes = 2 * (tm * K + K * E_pad + E_pad + tm * E_pad) * 4 + (1 << 20)
    vmem_bytes = int(min(max(vmem_bytes, 4 << 20), 32 << 20))

    out_pad = pl.pallas_call(
        _rec_head_kernel,
        out_shape=jax.ShapeDtypeStruct((rows_pad, E_pad), x.dtype),
        grid_spec=pltpu.PrefetchScalarGridSpec(
            num_scalar_prefetch=0,
            grid=(n_row_tiles,),
            in_specs=[
                pl.BlockSpec((tm, K), lambda i: (i, 0)),        # row tile of activations
                pl.BlockSpec((K, E_pad), lambda i: (0, 0)),     # weight, resident
                pl.BlockSpec((1, E_pad), lambda i: (0, 0)),     # bias, resident
            ],
            out_specs=pl.BlockSpec((tm, E_pad), lambda i: (i, 0)),
        ),
        compiler_params=pltpu.CompilerParams(
            dimension_semantics=("parallel",),
            vmem_limit_bytes=vmem_bytes,
        ),
        cost_estimate=cost,
    )(x2, w2, b2)

    return out_pad[:rows, :E].reshape(B, N, E)


if __name__ == "__main__":
    # Small shapes consistent with the module: tokens (B=2, N=16), in_dim=32,
    # in_chans=116 (RECHead default).
    B, N = 2, 16
    in_dim = 32
    in_chans = 116

    key = jax.random.PRNGKey(0)
    kx, kw, kb = jax.random.split(key, 3)

    x = jax.random.normal(kx, (B, N, in_dim), dtype=jnp.float32)
    weight = jax.random.normal(kw, (in_chans, in_dim), dtype=jnp.float32) * 0.02
    bias = jax.random.normal(kb, (in_chans,), dtype=jnp.float32) * 0.02

    out = rec_head_forward(x, weight, bias)
    out = jax.block_until_ready(out)

    # Pure-JAX reference of nn.Linear(in_dim, in_chans): y = x @ W.T + b.
    ref = jnp.einsum("bnd,ed->bne", x, weight) + bias[None, None, :]

    assert out.shape == (B, N, in_chans), out.shape
    assert jnp.allclose(out, ref, atol=1e-5, rtol=1e-5), float(jnp.max(jnp.abs(out - ref)))

    print("KERNEL_OK")
</pallas_src>

<mosaic_0001>
module attributes {stable_mosaic.version = 11 : i64} {
  func.func @_rec_head_kernel(%arg0: i32, %arg1: memref<32x32xf32, #tpu.memory_space<vmem>>, %arg2: memref<32x128xf32, #tpu.memory_space<vmem>>, %arg3: memref<1x128xf32, #tpu.memory_space<vmem>>, %arg4: memref<32x128xf32, #tpu.memory_space<vmem>>) attributes {dimension_semantics = [#tpu.dimension_semantics<parallel>], iteration_bounds = array<i64: 1>, scalar_prefetch = 0 : i64, scratch_operands = 0 : i64, tpu.core_type = #tpu.core_type<tc>, window_params = [{transform_indices = @transform_0, window_bounds = array<i64: 32, 32>}, {pipeline_mode = #tpu.pipeline_mode<synchronous>, transform_indices = @transform_1, window_bounds = array<i64: 32, 128>}, {pipeline_mode = #tpu.pipeline_mode<synchronous>, transform_indices = @transform_2, window_bounds = array<i64: 1, 128>}, {transform_indices = @transform_3, window_bounds = array<i64: 32, 128>}]} {
    %c0 = arith.constant 0 : index
    %c0_0 = arith.constant 0 : index
    %0 = vector.load %arg1[%c0, %c0_0] : memref<32x32xf32, #tpu.memory_space<vmem>>, vector<32x32xf32>
    %c0_1 = arith.constant 0 : index
    %c0_2 = arith.constant 0 : index
    %1 = vector.load %arg2[%c0_1, %c0_2] : memref<32x128xf32, #tpu.memory_space<vmem>>, vector<32x128xf32>
    %cst = arith.constant dense<0.000000e+00> : vector<32x128xf32>
    %2 = tpu.matmul %0, %1, %cst {dimension_numbers = #tpu.dot_dimension_numbers<[1], [0], [0], [1], [0, 0, 1, 1], [], []>} : vector<32x32xf32>, vector<32x128xf32>, vector<32x128xf32> -> vector<32x128xf32>
    %c0_3 = arith.constant 0 : index
    %c0_4 = arith.constant 0 : index
    %3 = vector.load %arg3[%c0_3, %c0_4] : memref<1x128xf32, #tpu.memory_space<vmem>>, vector<1x128xf32>
    %4 = vector.broadcast %3 : vector<1x128xf32> to vector<32x128xf32>
    %5 = arith.addf %2, %4 : vector<32x128xf32>
    %c0_5 = arith.constant 0 : index
    %c0_6 = arith.constant 0 : index
    %6 = vector.load %arg4[%c0_5, %c0_6] : memref<32x128xf32, #tpu.memory_space<vmem>>, vector<32x128xf32>
    tpu.vector_store %arg4[%c0_5, %c0_6], %5 {strides = array<i32>} : memref<32x128xf32, #tpu.memory_space<vmem>>, vector<32x128xf32>,
    return
  }
  func.func @transform_0(%arg0: i32) -> (i32, i32) {
    %c0_i32 = arith.constant 0 : i32
    %c0_i32_0 = arith.constant 0 : i32
    return %arg0, %c0_i32 : i32, i32
  }
  func.func @transform_1(%arg0: i32) -> (i32, i32) {
    %c0_i32 = arith.constant 0 : i32
    %c0_i32_0 = arith.constant 0 : i32
    %c0_i32_1 = arith.constant 0 : i32
    return %c0_i32, %c0_i32_0 : i32, i32
  }
  func.func @transform_2(%arg0: i32) -> (i32, i32) {
    %c0_i32 = arith.constant 0 : i32
    %c0_i32_0 = arith.constant 0 : i32
    %c0_i32_1 = arith.constant 0 : i32
    return %c0_i32, %c0_i32_0 : i32, i32
  }
  func.func @transform_3(%arg0: i32) -> (i32, i32) {
    %c0_i32 = arith.constant 0 : i32
    %c0_i32_0 = arith.constant 0 : i32
    return %arg0, %c0_i32 : i32, i32
  }
}

</mosaic_0001>

<bundles_post_ra>
// kernel: rec_head_forward.1
= control target key start
LH: loop header
LB: loop body
LE: loop exit
PB: predicated region body
PF: predicated region fallthrough
CT: control target
= control target key end

     0   :  { %vm30_vm0 = vcmask 261120   ;;  %s280_s0 = inlined_call_operand.vmem [shape: f32[32,32], index: 0, kind: input, shape index: {}]   ;;  %s281_s1 = inlined_call_operand.vmem [shape: f32[32,128], index: 1, kind: input, shape index: {}]   ;;  %s282_s2 = inlined_call_operand.vmem [shape: f32[1,128], index: 2, kind: input, shape index: {}]   ;;  %s283_s3 = inlined_call_operand.hbm [shape: f32[32,128], index: 3, kind: output, shape index: {}]  }
   0x1   :  { %v19_v0 = vld [vmem:[%s281_s1] sm:$0xff]  ;;  %v20_v1 = vld [vmem:[%s281_s1 + $0x8] sm:$0xff]  ;;  %v21_v2 = vld [vmem:[%s281_s1 + $0x10] sm:$0xff] }
   0x2   :  { %v175_v3 = vpack.c.bf16 %v20_v1, %v19_v0  ;;  %v22_v4 = vld [vmem:[%s281_s1 + $0x18] sm:$0xff]  ;;  %v15_v5 = vld [vmem:[%s280_s0] sm:$0xff]  ;;  %v17_v6 = vld [vmem:[%s280_s0 + $0x10] sm:$0xff] }
   0x3   :  { %v179_v7 = vpack.c.bf16 %v22_v4, %v21_v2  ;;  %169 = vmatprep.mubr.msk.f32.mxu0 %vm30_vm0, %v15_v5  ;;  %172 = vmatprep.mubr.msk.f32.mxu1 %vm30_vm0, %v17_v6 }
   0x4   :  { %8 = vsyncpa [#allocation3], 0  ;;  %176 = vmatprep.subr.bf16.mxu0 %v175_v3  ;;  %183 = vmatprep.subr.bf16.mxu1 %v175_v3  ;;  %v16_v8 = vld [vmem:[%s280_s0 + $0x8] sm:$0xff]  ;;  %v18_v9 = vld [vmem:[%s280_s0 + $0x18] sm:$0xff]  ;;  %s214_s29 = smov [#allocation2]  }
   0x5   :  { %178 = vmatpush3.bf16.msra.mxu0 %v175_v3  ;;  %185 = vmatpush3.bf16.msra.mxu1 %v175_v3  ;;  %v148_v10 = vld [vmem:[%s282_s2] ss:$0 sm:$0xff]  ;;  %s137_s30 = sshll.u32 %s214_s29, 4  ;;  %s138_s30 = int_to_ptr.vmem [resolvable:$true] %s137_s30 }
   0x6   :  { %180 = vmatprep.subr.bf16.mxu0 %v179_v7  ;;  %184 = vmatprep.subr.bf16.mxu1 %v179_v7  ;;  %s190_s0 = scalar_lea.vmem %s138_s30, 512  ;;  %p195_p1 = scmp.lt.s32.totalorder %s138_s30, %s138_s30 }
   0x7   :  { %p191_p0 = scmp.ne.s32.totalorder %s138_s30, %s190_s0  ;;  %p196_p2 = scmp.lt.s32.totalorder %s190_s0, %s190_s0 }
   0x9   :  { %182 = vmatpush3.bf16.msra.mxu0 %v179_v7  ;;  %186 = vmatpush3.bf16.msra.mxu1 %v179_v7  ;;  %p197_p3 = por %p196_p2, %p195_p1 }
   0xb   :  { %p198_p4 = pnand %p197_p3, %p191_p0 }
   0xc   :  { %170 = vmatmul.mubr.msk.f32.vlgmr.msra.gmra.mrb[0].mxu0 %vm30_vm0, %v16_v8  ;;  %173 = vmatmul.mubr.msk.f32.vlgmr.msra.gmra.mrb[0].mxu1 %vm30_vm0, %v18_v9 }
  0xdf   :  { %v171_v11 = vpop.f32.mrb[0].mxu0  ;;  %v174_v12 = vpop.f32.mrb[0].mxu1 }
  0xe0   :  { %v115_v13 = vadd.f32 %v171_v11, %v148_v10  ;;  %v125_v14 = vadd.f32 %v174_v12, %v148_v10  ;;  %v109_v15 = vpop.f32.mrb[1].mxu0  ;;  %v119_v16 = vpop.f32.mrb[1].mxu1 }
  0xe1   :  { %v110_v17 = vadd.f32 %v148_v10, %v109_v15  ;;  %v120_v18 = vadd.f32 %v148_v10, %v119_v16 }
  0xe2   :  { %129 = vst [vmem:[#allocation2 + $0x8] sm:$0xff] %v115_v13  ;;  %131 = vst [vmem:[#allocation2 + $0x18] sm:$0xff] %v125_v14 }
  0xe3   :  { %128 = vst [vmem:[#allocation2] sm:$0xff] %v110_v17  ;;  %130 = vst [vmem:[#allocation2 + $0x10] sm:$0xff] %v120_v18 }
  0xe4   :  { %201 = shalt.err (!%p198_p4)
}
  0xe5   :  { %s202_s5 = scalar_lea.hbm %s283_s3, 512 }
  0xe6   :  { %p203_p5 = scmp.ne.s32.totalorder %s283_s3, %s202_s5  ;;  %p206_p6 = scmp.lt.u32.totalorder %s202_s5, %s283_s3 }
  0xe8   :  { %p208_p7 = pnand %p206_p6, %p203_p5 }
  0xea   :  { %211 = shalt.err (!%p208_p7)
}
  0xeb   :  { %s215_s10 = smov 128   ;;  %s216_s11 = smov 8  }
  0xec   :  { %143 = dma.vmem_to_hbm [thread:$0]  %s138_s30, 512, %s283_s3, [#allocation3], %s215_s10, %s215_s10, %s216_s11  }
  0xed   :  { %212 = dma.done.wait [#allocation3], 512  }
  0xee   :  { %213 = vsyncadd [#allocation3], 4294966784 }
  0xef   :  { %147 = vsyncpa [#allocation3], 1 }

</bundles_post_ra>
